<compile_context>
chip_gen: v6e
topology: v6e:2x2x1
jax: 0.10.0
libtpu: 0.0.40
codegen_flags: <defaults>
</compile_context>

<pallas_src>
import math

import jax
import jax.numpy as jnp
from jax.experimental import pallas as pl
from jax.experimental.pallas import tpu as pltpu

# ----- config (consistent with the module's __init__) ------------------------
HID_DIM = 32
MLP_DIM = 32
MLP_LAYER = 3            # module_list has MLP_LAYER - 1 = 2 hidden layers
COMPONENTS = 4
FEAT_DIM = 8
BATCH = 8

_LOG_2PI = math.log(2.0 * math.pi)

# ----- derived layout constants (all static Python ints) ---------------------
CF = COMPONENTS * FEAT_DIM            # 32  (flat mu / scale width)
N_HID = MLP_LAYER - 1                 # 2
HEAD_W = 2 * CF + COMPONENTS          # 68  (mu | s_lin | logits)
OUT_W = 128                           # lane-dense output slab width
LIK_LANE = HEAD_W                     # 68  (lane holding the likelihood)
SEG_LANE = HEAD_W                     # 68  (seg indicator in spare head lanes)
ACT_W = HID_DIM + 1 + FEAT_DIM        # 41  activation slab: hs | tt | x
WL_LANE = MLP_DIM + CF                # 64  start lane of hidden-layer weights

# parameter-slab row layout
R_A = 0                               # first-layer block (rows 0:ACT_W)
R_WHEADS = -(-ACT_W // 8) * 8         # 48  fused head weights + seg indicator
R_BIAS = R_WHEADS + max(MLP_DIM, CF)  # 80  two bias rows
P_ROWS = -(-(R_BIAS + 2) // 8) * 8    # 88  total slab rows

assert WL_LANE + N_HID * MLP_DIM <= 128          # all matrices fit one lane row
assert (1 + N_HID) * MLP_DIM <= 128              # row-vector biases fit one row
assert SEG_LANE + COMPONENTS <= 128 and HEAD_W <= SEG_LANE
assert CF <= R_BIAS - R_WHEADS and MLP_DIM <= R_BIAS - R_WHEADS
assert LIK_LANE < OUT_W


# ----- Pallas kernel ----------------------------------------------------------
def gmm_kernel(act_ref, p_ref, out_ref):
    B = act_ref.shape[0]
    act = act_ref[...]                                    # [B, 41] = hs|tt|x

    # fused (linear1-folded) first layer + in-kernel x replication: one matmul
    wA = p_ref[R_A:R_A + ACT_W, 0:MLP_DIM + CF]           # [41, 64]
    pre = jnp.dot(act, wA, preferred_element_type=jnp.float32)   # [B, 64]
    b2 = p_ref[R_BIAS:R_BIAS + 1, 0:MLP_DIM]              # [1, M]
    out = jnp.tanh(pre[:, 0:MLP_DIM] + b2)                # [B, M]
    x_rep = pre[:, MLP_DIM:MLP_DIM + CF]                  # [B, CF] x tiled per comp

    # hidden MLP layers (weights live side-by-side in lanes 64:128 of rows 0:M)
    for i in range(N_HID):
        w = p_ref[0:MLP_DIM, WL_LANE + i * MLP_DIM:WL_LANE + (i + 1) * MLP_DIM]
        b = p_ref[R_BIAS:R_BIAS + 1, (1 + i) * MLP_DIM:(2 + i) * MLP_DIM]
        out = jnp.tanh(jnp.dot(out, w, preferred_element_type=jnp.float32) + b)

    # fused heads: one matmul -> [mu | s_lin | logits | junk] at lanes
    # [0:CF | CF:2CF | 2CF:2CF+C | rest] of a [B, 128] value.
    wh = p_ref[R_WHEADS:R_WHEADS + MLP_DIM, :]            # [M, 128]
    bh = p_ref[R_BIAS + 1:R_BIAS + 2, :]                  # [1, 128]
    heads = jnp.dot(out, wh, preferred_element_type=jnp.float32) + bh   # [B, 128]

    lane = jax.lax.broadcasted_iota(jnp.int32, (B, OUT_W), 1)
    is_scale = (lane >= CF) & (lane < 2 * CF)
    is_logit = (lane >= 2 * CF) & (lane < 2 * CF + COMPONENTS)

    # single full-width exp serves both scale lanes and softmax numerator;
    # discarded lanes are only ever where-selected away (never multiplied).
    zmax = jnp.max(jnp.where(is_logit, heads, -jnp.inf), axis=-1, keepdims=True)
    exp_all = jnp.exp(heads - jnp.where(is_logit, zmax, 0.0))   # [B, 128]
    ez = jnp.where(is_logit, exp_all, 0.0)
    sez = jnp.sum(ez, axis=-1, keepdims=True)                   # [B, 1]
    inv_sez = 1.0 / sez
    log_pri = (heads[:, 2 * CF:2 * CF + COMPONENTS] - zmax) - jnp.log(sez)

    # GMM log-prob: inv_var = 1/scale^2 (reuses exp_all), log|prec| = -sum(s_lin)
    mu = heads[:, 0:CF]                                   # [B, CF]
    s_lin = heads[:, CF:2 * CF]                           # [B, CF]
    scale_cf = exp_all[:, CF:2 * CF]                      # exp(s_lin)
    inv_var = 1.0 / (scale_cf * scale_cf)
    diff = x_rep - mu
    w_sq = diff * diff * inv_var                          # [B, CF]

    # merged segmented reduction: one matmul, sublane-stacked [w_sq ; s_lin]
    seg = p_ref[R_WHEADS:R_WHEADS + CF, SEG_LANE:SEG_LANE + COMPONENTS]  # [CF, C]
    stacked = jnp.concatenate([w_sq, s_lin], axis=0)      # [2B, CF]
    red = jnp.dot(stacked, seg, preferred_element_type=jnp.float32)      # [2B, C]
    quad = red[0:B]
    log_gdet = -red[B:2 * B]
    log_prob_g = -0.5 * (FEAT_DIM * _LOG_2PI + quad) + log_gdet

    # logsumexp over components
    weighted = log_pri + log_prob_g                       # [B, C]
    m = jnp.max(weighted, axis=-1, keepdims=True)
    lik = m + jnp.log(jnp.sum(jnp.exp(weighted - m), axis=-1, keepdims=True))

    # assemble the lane-dense output slab: mu | scale | pri | lik | junk
    out128 = jnp.where(is_scale, exp_all, heads)          # scale replaces s_lin
    out128 = jnp.where(is_logit, ez * inv_sez, out128)    # pri replaces logits
    out128 = jnp.where(lane == LIK_LANE, lik, out128)     # lik at lane 68
    out_ref[...] = out128


# ----- parameter init (deterministic, PyTorch-Linear-style uniform) -----------
def init_linear(key, in_f, out_f):
    kw, kb = jax.random.split(key)
    bound = 1.0 / math.sqrt(in_f)
    w = jax.random.uniform(kw, (out_f, in_f), jnp.float32, -bound, bound)
    b = jax.random.uniform(kb, (out_f,), jnp.float32, -bound, bound)
    return w, b


def init_params(key):
    keys = jax.random.split(key, 6 + N_HID)
    p = {}
    p['w1'], p['b1'] = init_linear(keys[0], 1, 1)
    p['w2'], p['b2'] = init_linear(keys[1], HID_DIM + 1, MLP_DIM)
    p['wl'], p['bl'] = [], []
    for i in range(N_HID):
        w, b = init_linear(keys[2 + i], MLP_DIM, MLP_DIM)
        p['wl'].append(w)
        p['bl'].append(b)
    k = 2 + N_HID
    p['wmu'], p['bmu'] = init_linear(keys[k], MLP_DIM, COMPONENTS * FEAT_DIM)
    p['wsc'], p['bsc'] = init_linear(keys[k + 1], MLP_DIM, COMPONENTS * FEAT_DIM)
    p['wpi'], p['bpi'] = init_linear(keys[k + 2], MLP_DIM, COMPONENTS)
    return p


def clamp_params(params):
    # matches `p.data *= p.data >= 0` (applied functionally; idempotent)
    return jax.tree_util.tree_map(lambda p: p * (p >= 0).astype(p.dtype), params)


# ----- one-time parameter preparation (hoisted out of the forward path) -------
def prepare_params(params):
    """Clamp, fold linear1 into linear2, fuse the heads, and pack everything
    into one dense [88, 128] f32 VMEM slab.  Run once per parameter update."""
    params = clamp_params(params)

    w1 = params['w1'][0, 0]
    b1 = params['b1'][0]
    w2 = params['w2']                                  # [M, H+1]
    w2h_t = w2[:, :HID_DIM].T                          # [H, M]
    w2t = w2[:, HID_DIM]                               # [M]
    w2t_eff = w1 * w2t                                 # linear1 folded in
    b2_eff = params['b2'] + b1 * w2t

    # x replication indicator: rep[f, c*F + f] = 1
    rep = (jnp.arange(CF)[None, :] % FEAT_DIM
           == jnp.arange(FEAT_DIM)[:, None]).astype(jnp.float32)     # [F, CF]
    # per-component segment indicator: seg[c*F + f, c] = 1
    seg = (jnp.arange(CF)[:, None] // FEAT_DIM
           == jnp.arange(COMPONENTS)[None, :]).astype(jnp.float32)   # [CF, C]

    w_heads = jnp.concatenate(
        [params['wmu'].T, params['wsc'].T, params['wpi'].T], axis=1)  # [M, 68]
    b_heads = jnp.concatenate(
        [params['bmu'], params['bsc'], params['bpi']])                # [68]

    slab = jnp.zeros((P_ROWS, 128), jnp.float32)
    # first-layer block (lanes 0:64): [hs rows | tt row | x-replication rows]
    slab = slab.at[0:HID_DIM, 0:MLP_DIM].set(w2h_t)
    slab = slab.at[HID_DIM, 0:MLP_DIM].set(w2t_eff)
    slab = slab.at[HID_DIM + 1:HID_DIM + 1 + FEAT_DIM,
                   MLP_DIM:MLP_DIM + CF].set(rep)
    # hidden layers side-by-side in lanes 64:128
    for i in range(N_HID):
        slab = slab.at[0:MLP_DIM,
                       WL_LANE + i * MLP_DIM:WL_LANE + (i + 1) * MLP_DIM].set(
                           params['wl'][i].T)
    # fused heads + seg indicator share rows 48:80
    slab = slab.at[R_WHEADS:R_WHEADS + MLP_DIM, 0:HEAD_W].set(w_heads)
    slab = slab.at[R_WHEADS:R_WHEADS + CF,
                   SEG_LANE:SEG_LANE + COMPONENTS].set(seg)
    # bias rows
    slab = slab.at[R_BIAS, 0:MLP_DIM].set(b2_eff)
    for i in range(N_HID):
        slab = slab.at[R_BIAS,
                       (1 + i) * MLP_DIM:(2 + i) * MLP_DIM].set(params['bl'][i])
    slab = slab.at[R_BIAS + 1, 0:HEAD_W].set(b_heads)
    return slab


# ----- forward wrapper ---------------------------------------------------------
def _batch_tile(batch):
    padded = -(-batch // 8) * 8
    return padded if padded <= 256 else 256   # >=256 rows/step once B is large


@jax.jit
def gmm_forward(param_slab, hidden_state, target_time, x):
    # TODO(synk): `target_time.requires_grad_(True)` is an autograd side-effect
    # with no forward-pass equivalent; omitted.
    B = hidden_state.shape[0]
    act = jnp.concatenate(
        [hidden_state, target_time.reshape(B, 1), x], axis=-1).astype(jnp.float32)
    TB = _batch_tile(B)
    Bp = -(-B // TB) * TB
    if Bp != B:
        act = jnp.pad(act, ((0, Bp - B), (0, 0)))

    out = pl.pallas_call(
        gmm_kernel,
        out_shape=jax.ShapeDtypeStruct((Bp, OUT_W), jnp.float32),
        grid=(Bp // TB,),
        in_specs=[pl.BlockSpec((TB, ACT_W), lambda i: (i, 0)),
                  # constant index_map -> param slab DMA'd once, stays resident
                  pl.BlockSpec((P_ROWS, 128), lambda i: (0, 0))],
        out_specs=pl.BlockSpec((TB, OUT_W), lambda i: (i, 0)),
        compiler_params=pltpu.CompilerParams(
            dimension_semantics=("parallel",)),
    )(act, param_slab)

    mu = out[:B, 0:CF].reshape(B, COMPONENTS, FEAT_DIM)
    scale = out[:B, CF:2 * CF].reshape(B, COMPONENTS, FEAT_DIM)
    pri = out[:B, 2 * CF:2 * CF + COMPONENTS]
    likelihood = out[:B, LIK_LANE]
    return likelihood, mu, scale, pri


# ----- pure-JAX reference (original formulation) for correctness check --------
def gmm_reference(params, hidden_state, target_time, x):
    params = clamp_params(params)
    t = target_time[:, None] * params['w1'][0, 0] + params['b1'][0]
    h = jnp.concatenate([hidden_state, t], axis=-1)
    out = jnp.tanh(h @ params['w2'].T + params['b2'])
    for w, b in zip(params['wl'], params['bl']):
        out = jnp.tanh(out @ w.T + b)
    mu = (out @ params['wmu'].T + params['bmu']).reshape(-1, COMPONENTS, FEAT_DIM)
    scale = jnp.exp((out @ params['wsc'].T + params['bsc'])
                    ).reshape(-1, COMPONENTS, FEAT_DIM)
    pri = jax.nn.softmax(out @ params['wpi'].T + params['bpi'], axis=-1)
    xe = x[:, None, :]
    prec = 1.0 / scale
    log_gp = jnp.sum((mu * mu + xe * xe - 2 * xe * mu) * prec ** 2, axis=-1)
    log_gdet = jnp.sum(jnp.log(prec), axis=-1)
    log_prob_g = -0.5 * (FEAT_DIM * _LOG_2PI + log_gp) + log_gdet
    weighted = jnp.log(pri) + log_prob_g
    lik = jax.scipy.special.logsumexp(weighted, axis=-1)
    return lik, mu, scale, pri


if __name__ == "__main__":
    key = jax.random.PRNGKey(0)
    kp, kh, kt, kx = jax.random.split(key, 4)

    params = init_params(kp)
    param_slab = prepare_params(params)            # one-time prep (not per call)

    hidden_state = jax.random.normal(kh, (BATCH, HID_DIM), jnp.float32)
    target_time = jax.random.uniform(kt, (BATCH,), jnp.float32)
    x = jax.random.normal(kx, (BATCH, FEAT_DIM), jnp.float32)

    lik, mu, scale, pri = gmm_forward(param_slab, hidden_state, target_time, x)
    jax.block_until_ready((lik, mu, scale, pri))

    lik_r, mu_r, scale_r, pri_r = gmm_reference(params, hidden_state,
                                                target_time, x)
    assert lik.shape == (BATCH,)
    assert mu.shape == (BATCH, COMPONENTS, FEAT_DIM)
    assert scale.shape == (BATCH, COMPONENTS, FEAT_DIM)
    assert pri.shape == (BATCH, COMPONENTS)
    for a, b in ((lik, lik_r), (mu, mu_r), (scale, scale_r), (pri, pri_r)):
        assert jnp.allclose(a, b, rtol=2e-3, atol=2e-3)

    print("KERNEL_OK")
</pallas_src>

<mosaic_0001>
module attributes {stable_mosaic.version = 11 : i64} {
  func.func @gmm_kernel(%arg0: i32, %arg1: memref<8x41xf32, #tpu.memory_space<vmem>>, %arg2: memref<88x128xf32, #tpu.memory_space<vmem>>, %arg3: memref<8x128xf32, #tpu.memory_space<vmem>>) attributes {dimension_semantics = [#tpu.dimension_semantics<parallel>], iteration_bounds = array<i64: 1>, scalar_prefetch = 0 : i64, scratch_operands = 0 : i64, tpu.core_type = #tpu.core_type<tc>, window_params = [{transform_indices = @transform_0, window_bounds = array<i64: 8, 41>}, {pipeline_mode = #tpu.pipeline_mode<synchronous>, transform_indices = @transform_1, window_bounds = array<i64: 88, 128>}, {transform_indices = @transform_2, window_bounds = array<i64: 8, 128>}]} {
    %c0 = arith.constant 0 : index
    %c0_0 = arith.constant 0 : index
    %0 = vector.load %arg1[%c0, %c0_0] : memref<8x41xf32, #tpu.memory_space<vmem>>, vector<8x41xf32>
    %c0_1 = arith.constant 0 : index
    %c0_2 = arith.constant 0 : index
    %1 = vector.load %arg2[%c0_1, %c0_2] : memref<88x128xf32, #tpu.memory_space<vmem>>, vector<41x64xf32>
    %cst = arith.constant dense<0.000000e+00> : vector<8x64xf32>
    %2 = tpu.matmul %0, %1, %cst {dimension_numbers = #tpu.dot_dimension_numbers<[1], [0], [0], [1], [0, 0, 1, 1], [], []>} : vector<8x41xf32>, vector<41x64xf32>, vector<8x64xf32> -> vector<8x64xf32>
    %c80 = arith.constant 80 : index
    %c0_3 = arith.constant 0 : index
    %3 = vector.load %arg2[%c80, %c0_3] : memref<88x128xf32, #tpu.memory_space<vmem>>, vector<1x32xf32>
    %4 = vector.extract_strided_slice %2 {offsets = [0, 0], sizes = [8, 32], strides = [1, 1]} : vector<8x64xf32> to vector<8x32xf32>
    %5 = vector.broadcast %3 : vector<1x32xf32> to vector<8x32xf32>
    %6 = arith.addf %4, %5 : vector<8x32xf32>
    %7 = math.tanh %6 : vector<8x32xf32>
    %8 = vector.extract_strided_slice %2 {offsets = [0, 32], sizes = [8, 32], strides = [1, 1]} : vector<8x64xf32> to vector<8x32xf32>
    %c0_4 = arith.constant 0 : index
    %c64 = arith.constant 64 : index
    %9 = vector.load %arg2[%c0_4, %c64] : memref<88x128xf32, #tpu.memory_space<vmem>>, vector<32x32xf32>
    %c80_5 = arith.constant 80 : index
    %c32 = arith.constant 32 : index
    %10 = vector.load %arg2[%c80_5, %c32] : memref<88x128xf32, #tpu.memory_space<vmem>>, vector<1x32xf32>
    %cst_6 = arith.constant dense<0.000000e+00> : vector<8x32xf32>
    %11 = tpu.matmul %7, %9, %cst_6 {dimension_numbers = #tpu.dot_dimension_numbers<[1], [0], [0], [1], [0, 0, 1, 1], [], []>} : vector<8x32xf32>, vector<32x32xf32>, vector<8x32xf32> -> vector<8x32xf32>
    %12 = vector.broadcast %10 : vector<1x32xf32> to vector<8x32xf32>
    %13 = arith.addf %11, %12 : vector<8x32xf32>
    %14 = math.tanh %13 : vector<8x32xf32>
    %c0_7 = arith.constant 0 : index
    %c96 = arith.constant 96 : index
    %15 = vector.load %arg2[%c0_7, %c96] : memref<88x128xf32, #tpu.memory_space<vmem>>, vector<32x32xf32>
    %c80_8 = arith.constant 80 : index
    %c64_9 = arith.constant 64 : index
    %16 = vector.load %arg2[%c80_8, %c64_9] : memref<88x128xf32, #tpu.memory_space<vmem>>, vector<1x32xf32>
    %cst_10 = arith.constant dense<0.000000e+00> : vector<8x32xf32>
    %17 = tpu.matmul %14, %15, %cst_10 {dimension_numbers = #tpu.dot_dimension_numbers<[1], [0], [0], [1], [0, 0, 1, 1], [], []>} : vector<8x32xf32>, vector<32x32xf32>, vector<8x32xf32> -> vector<8x32xf32>
    %18 = vector.broadcast %16 : vector<1x32xf32> to vector<8x32xf32>
    %19 = arith.addf %17, %18 : vector<8x32xf32>
    %20 = math.tanh %19 : vector<8x32xf32>
    %c48 = arith.constant 48 : index
    %c0_11 = arith.constant 0 : index
    %21 = vector.load %arg2[%c48, %c0_11] : memref<88x128xf32, #tpu.memory_space<vmem>>, vector<32x128xf32>
    %c81 = arith.constant 81 : index
    %c0_12 = arith.constant 0 : index
    %22 = vector.load %arg2[%c81, %c0_12] : memref<88x128xf32, #tpu.memory_space<vmem>>, vector<1x128xf32>
    %cst_13 = arith.constant dense<0.000000e+00> : vector<8x128xf32>
    %23 = tpu.matmul %20, %21, %cst_13 {dimension_numbers = #tpu.dot_dimension_numbers<[1], [0], [0], [1], [0, 0, 1, 1], [], []>} : vector<8x32xf32>, vector<32x128xf32>, vector<8x128xf32> -> vector<8x128xf32>
    %24 = vector.broadcast %22 : vector<1x128xf32> to vector<8x128xf32>
    %25 = arith.addf %23, %24 : vector<8x128xf32>
    %26 = tpu.iota {dimensions = array<i32: 1>} : vector<8x128xi32>
    %c32_i32 = arith.constant 32 : i32
    %27 = vector.broadcast %c32_i32 : i32 to vector<8x128xi32>
    %28 = arith.cmpi sge, %26, %27 : vector<8x128xi32>
    %c64_i32 = arith.constant 64 : i32
    %29 = vector.broadcast %c64_i32 : i32 to vector<8x128xi32>
    %30 = arith.cmpi slt, %26, %29 : vector<8x128xi32>
    %31 = arith.andi %28, %30 : vector<8x128xi1>
    %c64_i32_14 = arith.constant 64 : i32
    %32 = vector.broadcast %c64_i32_14 : i32 to vector<8x128xi32>
    %33 = arith.cmpi sge, %26, %32 : vector<8x128xi32>
    %c68_i32 = arith.constant 68 : i32
    %34 = vector.broadcast %c68_i32 : i32 to vector<8x128xi32>
    %35 = arith.cmpi slt, %26, %34 : vector<8x128xi32>
    %36 = arith.andi %33, %35 : vector<8x128xi1>
    %cst_15 = arith.constant 0xFF800000 : f32
    %37 = vector.broadcast %cst_15 : f32 to vector<8x128xf32>
    %38 = arith.select %36, %25, %37 : vector<8x128xi1>, vector<8x128xf32>
    %cst_16 = arith.constant dense<0xFF800000> : vector<8xf32>
    %39 = vector.multi_reduction <maximumf>, %38, %cst_16 [1] : vector<8x128xf32> to vector<8xf32>
    %40 = vector.shape_cast %39 : vector<8xf32> to vector<8x1xf32>
    %cst_17 = arith.constant 0.000000e+00 : f32
    %41 = vector.shape_cast %40 : vector<8x1xf32> to vector<8x1xf32>
    %42 = vector.broadcast %41 : vector<8x1xf32> to vector<8x128xf32>
    %43 = vector.broadcast %cst_17 : f32 to vector<8x128xf32>
    %44 = arith.select %36, %42, %43 : vector<8x128xi1>, vector<8x128xf32>
    %45 = arith.subf %25, %44 : vector<8x128xf32>
    %46 = math.exp %45 : vector<8x128xf32>
    %cst_18 = arith.constant 0.000000e+00 : f32
    %47 = vector.broadcast %cst_18 : f32 to vector<8x128xf32>
    %48 = arith.select %36, %46, %47 : vector<8x128xi1>, vector<8x128xf32>
    %cst_19 = arith.constant dense<0.000000e+00> : vector<8xf32>
    %49 = vector.multi_reduction <add>, %48, %cst_19 [1] : vector<8x128xf32> to vector<8xf32>
    %50 = vector.shape_cast %49 : vector<8xf32> to vector<8x1xf32>
    %cst_20 = arith.constant 1.000000e+00 : f32
    %51 = vector.broadcast %cst_20 : f32 to vector<8x1xf32>
    %52 = arith.divf %51, %50 : vector<8x1xf32>
    %53 = vector.extract_strided_slice %25 {offsets = [0, 64], sizes = [8, 4], strides = [1, 1]} : vector<8x128xf32> to vector<8x4xf32>
    %54 = vector.broadcast %40 : vector<8x1xf32> to vector<8x4xf32>
    %55 = arith.subf %53, %54 : vector<8x4xf32>
    %56 = math.log %50 : vector<8x1xf32>
    %57 = vector.broadcast %56 : vector<8x1xf32> to vector<8x4xf32>
    %58 = arith.subf %55, %57 : vector<8x4xf32>
    %59 = vector.extract_strided_slice %25 {offsets = [0, 0], sizes = [8, 32], strides = [1, 1]} : vector<8x128xf32> to vector<8x32xf32>
    %60 = vector.extract_strided_slice %25 {offsets = [0, 32], sizes = [8, 32], strides = [1, 1]} : vector<8x128xf32> to vector<8x32xf32>
    %61 = vector.extract_strided_slice %46 {offsets = [0, 32], sizes = [8, 32], strides = [1, 1]} : vector<8x128xf32> to vector<8x32xf32>
    %62 = arith.mulf %61, %61 : vector<8x32xf32>
    %cst_21 = arith.constant 1.000000e+00 : f32
    %63 = vector.broadcast %cst_21 : f32 to vector<8x32xf32>
    %64 = arith.divf %63, %62 : vector<8x32xf32>
    %65 = arith.subf %8, %59 : vector<8x32xf32>
    %66 = arith.mulf %65, %65 : vector<8x32xf32>
    %67 = arith.mulf %66, %64 : vector<8x32xf32>
    %c48_22 = arith.constant 48 : index
    %c68 = arith.constant 68 : index
    %68 = vector.load %arg2[%c48_22, %c68] : memref<88x128xf32, #tpu.memory_space<vmem>>, vector<32x4xf32>
    %69 = tpu.concatenate %67, %60 in 0 : vector<8x32xf32>, vector<8x32xf32> -> vector<16x32xf32>
    %cst_23 = arith.constant dense<0.000000e+00> : vector<16x4xf32>
    %70 = tpu.matmul %69, %68, %cst_23 {dimension_numbers = #tpu.dot_dimension_numbers<[1], [0], [0], [1], [0, 0, 1, 1], [], []>} : vector<16x32xf32>, vector<32x4xf32>, vector<16x4xf32> -> vector<16x4xf32>
    %71 = vector.extract_strided_slice %70 {offsets = [0, 0], sizes = [8, 4], strides = [1, 1]} : vector<16x4xf32> to vector<8x4xf32>
    %72 = vector.extract_strided_slice %70 {offsets = [8, 0], sizes = [8, 4], strides = [1, 1]} : vector<16x4xf32> to vector<8x4xf32>
    %cst_24 = arith.constant 0.000000e+00 : f32
    %73 = vector.broadcast %cst_24 : f32 to vector<8x4xf32>
    %74 = arith.subf %73, %72 : vector<8x4xf32>
    %cst_25 = arith.constant 14.7030163 : f32
    %75 = vector.broadcast %cst_25 : f32 to vector<8x4xf32>
    %76 = arith.addf %75, %71 : vector<8x4xf32>
    %cst_26 = arith.constant -5.000000e-01 : f32
    %77 = vector.broadcast %cst_26 : f32 to vector<8x4xf32>
    %78 = arith.mulf %77, %76 : vector<8x4xf32>
    %79 = arith.addf %78, %74 : vector<8x4xf32>
    %80 = arith.addf %58, %79 : vector<8x4xf32>
    %cst_27 = arith.constant dense<0xFF800000> : vector<8xf32>
    %81 = vector.multi_reduction <maximumf>, %80, %cst_27 [1] : vector<8x4xf32> to vector<8xf32>
    %82 = vector.shape_cast %81 : vector<8xf32> to vector<8x1xf32>
    %83 = vector.broadcast %82 : vector<8x1xf32> to vector<8x4xf32>
    %84 = arith.subf %80, %83 : vector<8x4xf32>
    %85 = math.exp %84 : vector<8x4xf32>
    %cst_28 = arith.constant dense<0.000000e+00> : vector<8xf32>
    %86 = vector.multi_reduction <add>, %85, %cst_28 [1] : vector<8x4xf32> to vector<8xf32>
    %87 = vector.shape_cast %86 : vector<8xf32> to vector<8x1xf32>
    %88 = math.log %87 : vector<8x1xf32>
    %89 = arith.addf %82, %88 : vector<8x1xf32>
    %90 = arith.select %31, %46, %25 : vector<8x128xi1>, vector<8x128xf32>
    %91 = vector.broadcast %52 : vector<8x1xf32> to vector<8x128xf32>
    %92 = arith.mulf %48, %91 : vector<8x128xf32>
    %93 = arith.select %36, %92, %90 : vector<8x128xi1>, vector<8x128xf32>
    %c68_i32_29 = arith.constant 68 : i32
    %94 = vector.broadcast %c68_i32_29 : i32 to vector<8x128xi32>
    %95 = arith.cmpi eq, %26, %94 : vector<8x128xi32>
    %96 = vector.shape_cast %89 : vector<8x1xf32> to vector<8x1xf32>
    %97 = vector.broadcast %96 : vector<8x1xf32> to vector<8x128xf32>
    %98 = arith.select %95, %97, %93 : vector<8x128xi1>, vector<8x128xf32>
    %c0_30 = arith.constant 0 : index
    %c0_31 = arith.constant 0 : index
    %99 = vector.load %arg3[%c0_30, %c0_31] : memref<8x128xf32, #tpu.memory_space<vmem>>, vector<8x128xf32>
    tpu.vector_store %arg3[%c0_30, %c0_31], %98 {strides = array<i32>} : memref<8x128xf32, #tpu.memory_space<vmem>>, vector<8x128xf32>,
    return
  }
  func.func @transform_0(%arg0: i32) -> (i32, i32) {
    %c0_i32 = arith.constant 0 : i32
    %c0_i32_0 = arith.constant 0 : i32
    return %arg0, %c0_i32 : i32, i32
  }
  func.func @transform_1(%arg0: i32) -> (i32, i32) {
    %c0_i32 = arith.constant 0 : i32
    %c0_i32_0 = arith.constant 0 : i32
    %c0_i32_1 = arith.constant 0 : i32
    return %c0_i32, %c0_i32_0 : i32, i32
  }
  func.func @transform_2(%arg0: i32) -> (i32, i32) {
    %c0_i32 = arith.constant 0 : i32
    %c0_i32_0 = arith.constant 0 : i32
    return %arg0, %c0_i32 : i32, i32
  }
}

</mosaic_0001>

<bundles_post_ra>
// kernel: gmm_forward.1
= control target key start
LH: loop header
LB: loop body
LE: loop exit
PB: predicated region body
PF: predicated region fallthrough
CT: control target
= control target key end

     0   :  { %7 = vsyncpa [#allocation3], 0  ;;  %s704_s9 = smov [#allocation2]   ;;  %s814_s0 = inlined_call_operand.vmem [shape: f32[8,41], index: 0, kind: input, shape index: {}]   ;;  %s815_s1 = inlined_call_operand.hbm [shape: f32[88,128], index: 1, kind: input, shape index: {}]   ;;  %s816_s2 = inlined_call_operand.vmem [shape: f32[8,128], index: 2, kind: output, shape index: {}]  }
   0x1   :  { %s15_s10 = sshll.u32 %s704_s9, 4  ;;  %s16_s10 = int_to_ptr.vmem [resolvable:$true] %s15_s10 }
   0x2   :  { %s690_s11 = scalar_lea.vmem %s16_s10, 1408  ;;  %p695_p1 = scmp.lt.s32.totalorder %s16_s10, %s16_s10 }
   0x3   :  { %p691_p0 = scmp.ne.s32.totalorder %s16_s10, %s690_s11  ;;  %p696_p2 = scmp.lt.s32.totalorder %s690_s11, %s690_s11 }
   0x5   :  { %p697_p3 = por %p696_p2, %p695_p1 }
   0x7   :  { %p698_p4 = pnand %p697_p3, %p691_p0 }
   0x9   :  { %701 = shalt.err (!%p698_p4)
}
   0xa   :  { %s705_s12 = smov 128   ;;  %s706_s13 = smov 8  }
   0xb   :  { %21 = dma.hbm_to_vmem [thread:$0]  %s815_s1, 1408, %s16_s10, [#allocation3], %s705_s12, %s705_s12, %s706_s13  }
   0xc   :  { %702 = dma.done.wait [#allocation3], 1408  }
   0xd   :  { %703 = vsyncadd [#allocation3], 4294965888  ;;  %v707_v0 = vmov 0.0   ;;  %vm708_vm0 = vmmov 0   ;;  %vm36_vm1 = vcmask 1040384   ;;  %v30_v2 = vld [vmem:[#allocation2 + $0x20] sm:$0xff]  ;;  %v387_v35 = vlaneseq }
   0xe   :  { %596 = vmatprep.subr.mxu0 %v707_v0  ;;  %608 = vmatprep.mubr.msk.f32.mxu0 %vm708_vm0, %v707_v0  ;;  %v31_v1 = vld [vmem:[#allocation2 + $0x28] sm:$0x1]  ;;  %v29_v3 = vld [vmem:[#allocation2 + $0x18] sm:$0xff]  ;;  %s709_s1 = smov 64   ;;  %v28_v5 = vld [vmem:[#allocation2 + $0x10] sm:$0xff]  ;;  %vm32_vm2 = vcmask 334848  }
   0xf   :  { %611 = vmatprep.subr.mxu1 %v707_v0  ;;  %619 = vmatprep.mubr.msk.f32.mxu1 %vm708_vm0, %v707_v0  ;;  %v27_v4 = vld [vmem:[#allocation2 + $0x8] sm:$0xff]  ;;  %v26_v6 = vld [vmem:[#allocation2] sm:$0xff]  ;;  %v561_v8 = vld [vmem:[#allocation2 + $0x50] ss:$0 sm:$0xff]  ;;  %s710_s18 = smov 96   ;;  %s711_s19 = smov 32  }
  0x10   :  { %597 = vmatpush3.msk.msra.mxu0 %vm36_vm1, %v31_v1  ;;  %131 = vrot.lane.b32.xlu0 %v29_v3, %s709_s1  ;;  %v25_v7 = vld [vmem:[%s814_s0] sm:$0xff]  ;;  %vm141_vm3 = vcmask 261120   ;;  %v308_v26 = vld [vmem:[#allocation2 + $0x48] sm:$0xff]  ;;  %v306_v28 = vld [vmem:[#allocation2 + $0x38] sm:$0xff]  ;;  %v776_v36 = vand.u32 127, %v387_v35  ;;  %s712_s0 = smov 60  }
  0x11   :  { %598 = vmatprep.subr.mxu0 %v707_v0  ;;  %127 = vrot.lane.b32.xlu1 %v27_v4, %s709_s1  ;;  %v307_v27 = vld [vmem:[#allocation2 + $0x40] sm:$0xff]  ;;  %v305_v29 = vld [vmem:[#allocation2 + $0x30] sm:$0xff]  ;;  %vm530_vm7 = vcmask 556544   ;;  %vm541_vm8 = vcmask 31744  }
  0x12   :  { %599 = vmatpush3.msra.mxu0 %v30_v2  ;;  %vm392_vm4 = vcmp.ge.s32.totalorder %v776_v36, 64  ;;  %vm393_vm5 = vcmp.lt.s32.totalorder %v776_v36, 68  ;;  %v564_v37 = vld [vmem:[#allocation2 + $0x51] ss:$0 sm:$0xff]  ;;  %vm389_vm9 = vcmp.ge.s32.totalorder %v776_v36, 32  ;;  %vm390_vm10 = vcmp.lt.s32.totalorder %v776_v36, 64 }
  0x13   :  { %600 = vmatprep.subr.mxu0 %v707_v0  ;;  %vm780_vm6 = vmand %vm392_vm4, %vm393_vm5  ;;  %vm551_vm12 = vcmp.eq.s32.totalorder %v776_v36, 68 }
  0x14   :  { %601 = vmatpush3.msra.mxu0 %v29_v3  ;;  %129 = vrot.lane.b32.xlu0 %v28_v5, %s709_s1  ;;  %vm391_vm11 = vmand %vm389_vm9, %vm390_vm10 }
  0x15   :  { %602 = vmatprep.subr.mxu0 %v707_v0  ;;  %125 = vrot.lane.b32.xlu1 %v26_v6, %s709_s1 }
  0x16   :  { %603 = vmatpush3.msra.mxu0 %v28_v5 }
  0x17   :  { %604 = vmatprep.subr.mxu0 %v707_v0 }
  0x18   :  { %605 = vmatpush3.msra.mxu0 %v27_v4  ;;  %138 = vrot.lane.b32.xlu0 %v561_v8, %s710_s18 }
  0x19   :  { %606 = vmatprep.subr.mxu0 %v707_v0  ;;  %222 = vrot.lane.b32.xlu1 %v29_v3, %s711_s19 }
  0x1a   :  { %607 = vmatpush3.msra.mxu0 %v26_v6 }
  0x1b   :  { %609 = vmatmul.mubr.msk.f32.vlgmr.msra.gmra.mxu0 %vm32_vm2, %v25_v7  ;;  %633 = vmatprep.subr.mxu0 %v707_v0 }
  0x1c   :  { %641 = vmatprep.mubr.msk.f32.mxu0 %vm708_vm0, %v707_v0  ;;  %220 = vrot.lane.b32.xlu0 %v28_v5, %s711_s19 }
  0x1d   :  { %218 = vrot.lane.b32.xlu1 %v27_v4, %s711_s19  ;;  %634 = vmatpush3.msra.mxu0 %v308_v26 }
  0x1e   :  { %635 = vmatprep.subr.mxu0 %v707_v0 }
  0x1f   :  { %636 = vmatpush3.msra.mxu0 %v307_v27 }
  0x20   :  { %216 = vrot.lane.b32.xlu0 %v26_v6, %s711_s19  ;;  %637 = vmatprep.subr.mxu0 %v707_v0 }
  0x21   :  { %228 = vrot.lane.b32.xlu1 %v561_v8, %s709_s1  ;;  %638 = vmatpush3.msra.mxu0 %v306_v28 }
  0x22   :  { %639 = vmatprep.subr.mxu0 %v707_v0 }
  0x23   :  { %640 = vmatpush3.msra.mxu0 %v305_v29 }
  0x82   :  { %v132_v9 = vpop.permute.xlu0 %131 }
  0x83   :  { %612 = vmatpush3.msra.mxu1 %v132_v9  ;;  %v128_v10 = vpop.permute.xlu1 %127 }
  0x84   :  { %613 = vmatprep.subr.mxu1 %v707_v0 }
  0x86   :  { %v130_v11 = vpop.permute.xlu0 %129 }
  0x87   :  { %614 = vmatpush3.msra.mxu1 %v130_v11  ;;  %v126_v12 = vpop.permute.xlu1 %125 }
  0x88   :  { %615 = vmatprep.subr.mxu1 %v707_v0 }
  0x89   :  { %616 = vmatpush3.msra.mxu1 %v128_v10 }
  0x8a   :  { %617 = vmatprep.subr.mxu1 %v707_v0  ;;  %v139_v17 = vpop.permute.xlu0 %138 }
  0x8b   :  { %618 = vmatpush3.msra.mxu1 %v126_v12  ;;  %v223_v18 = vpop.permute.xlu1 %222 }
  0x8c   :  { %622 = vmatprep.subr.mxu1 %v707_v0 }
  0x8e   :  { %v221_v19 = vpop.permute.xlu0 %220 }
  0x8f   :  { %v219_v20 = vpop.permute.xlu1 %218 }
  0x92   :  { %v217_v21 = vpop.permute.xlu0 %216 }
  0x93   :  { %v229_v30 = vpop.permute.xlu1 %228 }
  0xdb   :  { %v762_v13 = vpop.f32.mrf.mxu0 }
  0xdc   :  { %v115_v14 = vadd.f32 %v561_v8, %v762_v13 }
  0xdd   :  { %v610_v15 = vpop.f32.mrf.mxu0 }
  0xde   :  { %664 = vtanh.f32 %v115_v14 }
  0xeb   :  { %v665_v16 = vpop.eup %664 }
  0xec   :  { %620 = vmatmul.mubr.msk.f32.vlgmr.msra.gmra.mxu1 %vm141_vm3, %v665_v16 }
  0xed   :  { %630 = vmatprep.mubr.msk.f32.mxu1 %vm708_vm0, %v707_v0  ;;  %623 = vmatpush3.msra.mxu1 %v223_v18 }
  0xee   :  { %624 = vmatprep.subr.mxu1 %v707_v0 }
  0xef   :  { %625 = vmatpush3.msra.mxu1 %v221_v19 }
  0xf0   :  { %626 = vmatprep.subr.mxu1 %v707_v0 }
  0xf1   :  { %627 = vmatpush3.msra.mxu1 %v219_v20 }
  0xf2   :  { %628 = vmatprep.subr.mxu1 %v707_v0 }
  0xf3   :  { %629 = vmatpush3.msra.mxu1 %v217_v21 }
 0x1ac   :  { %v211_v22 = vpop.f32.mrf.mxu1 }
 0x1ad   :  { %v212_v23 = vadd.f32 %v211_v22, %v139_v17 }
 0x1ae   :  { %v621_v24 = vpop.f32.mrf.mxu1 }
 0x1af   :  { %666 = vtanh.f32 %v212_v23 }
 0x1bc   :  { %v667_v25 = vpop.eup %666 }
 0x1bd   :  { %631 = vmatmul.mubr.msk.f32.vlgmr.msra.gmra.mxu1 %vm141_vm3, %v667_v25 }
 0x27d   :  { %v300_v31 = vpop.f32.mrf.mxu1 }
 0x27e   :  { %v301_v32 = vadd.f32 %v300_v31, %v229_v30 }
 0x27f   :  { %v632_v33 = vpop.f32.mrf.mxu1 }
 0x280   :  { %668 = vtanh.f32 %v301_v32 }
 0x28d   :  { %v669_v34 = vpop.eup %668 }
 0x28e   :  { %642 = vmatmul.mubr.msk.f32.vlgmr.msra.gmra.mxu0 %vm141_vm3, %v669_v34 }
 0x34e   :  { %v383_v38 = vpop.f32.mrf.mxu0 }
 0x34f   :  { %v784_v40 = vadd.f32 %v564_v37, %v383_v38 }
 0x350   :  { %v643_v41 = vpop.f32.mrf.mxu0 }
 0x351   :  { %415 = vrot.lane.b32.xlu1 %v784_v40, %s711_s19  ;;  %v395_v42 = vsel %vm780_vm6, %v784_v40, -inf }
 0x352   :  { %396 = vmax.xlane.f32.xlu0 %v395_v42 }
 0x355   :  { %436 = vrot.lane.b32.xlu1 %v308_v26, %s712_s0 }
 0x359   :  { %434 = vrot.lane.b32.xlu1 %v307_v27, %s712_s0 }
 0x35d   :  { %432 = vrot.lane.b32.xlu1 %v306_v28, %s712_s0 }
 0x361   :  { %430 = vrot.lane.b32.xlu1 %v305_v29, %s712_s0 }
 0x3c3   :  { %v416_v43 = vpop.permute.xlu1 %415 }
 0x3c4   :  { %v418_v54 = vsub.f32 %v762_v13, %v416_v43 }
 0x3c6   :  { %v419_v55 = vmul.f32 %v418_v54, %v418_v54 }
 0x3c7   :  { %v437_v44 = vpop.permute.xlu1 %436 }
 0x3c8   :  { %644 = vmatprep.subr.mxu1 %v437_v44 }
 0x3c9   :  { %645 = vmatpush3.msra.mxu1 %v437_v44 }
 0x3cb   :  { %v435_v45 = vpop.permute.xlu1 %434 }
 0x3cc   :  { %646 = vmatprep.subr.mxu1 %v435_v45 }
 0x3cd   :  { %647 = vmatpush3.msra.mxu1 %v435_v45 }
 0x3cf   :  { %v433_v48 = vpop.permute.xlu1 %432 }
 0x3d0   :  { %648 = vmatprep.subr.mxu1 %v433_v48 }
 0x3d1   :  { %649 = vmatpush3.msra.mxu1 %v433_v48 }
 0x3d3   :  { %v431_v51 = vpop.permute.xlu1 %430 }
 0x3d4   :  { %650 = vmatprep.subr.mxu1 %v431_v51 }
 0x3d5   :  { %651 = vmatpush3.msra.mxu1 %v431_v51 }
 0x3db   :  { %v397_v46 = vpop.xlane.xlu0 %396 }
 0x3dc   :  { %v398_v47 = vsel %vm780_vm6, %v397_v46, 0.0  ;;  %v407_v6 = vsub.f32 %v784_v40, %v397_v46 }
 0x3dd   :  { %v399_v49 = vsub.f32 %v784_v40, %v398_v47 }
 0x3df   :  { %v400_v50 = vmul.f32 1.442695, %v399_v49 }
 0x3e1   :  { %670 = vpow2.f32 %v400_v50 }
 0x3ee   :  { %v671_v52 = vpop.eup %670 }
 0x3ef   :  { %v411_v53 = vmul.f32 %v671_v52, %v671_v52  ;;  %v402_v58 = vsel %vm780_vm6, %v671_v52, 0.0  ;;  %v548_v22 = vsel %vm391_vm11, %v671_v52, %v784_v40 }
 0x3f1   :  { %672 = vrcp.f32 %v411_v53 }
 0x3fe   :  { %v673_v56 = vpop.eup %672 }
 0x3ff   :  { %v420_v57 = vmul.f32 %v673_v56, %v419_v55 }
 0x401   :  { %422 = vrot.lane.b32.xlu1 %v420_v57, %s710_s18 }
 0x405   :  { %424 = vrot.lane.b32.xlu1 %v784_v40, %s710_s18 }
 0x429   :  { %403 = vadd.xlane.f32.xlu1 %v402_v58 }
 0x473   :  { %v423_v59 = vpop.permute.xlu1 %422 }
 0x474   :  { %652 = vmatprep.mubr.msk.f32.mxu1 %vm141_vm3, %v423_v59 }
 0x477   :  { %v425_v60 = vpop.permute.xlu1 %424 }
 0x478   :  { %653 = vmatmul.mubr.msk.f32.vlgmr.msra.gmra.mxu1 %vm141_vm3, %v425_v60 }
 0x4b2   :  { %v404_v3 = vpop.xlane.xlu1 %403 }
 0x4b3   :  { %674 = vlog2.f32 %v404_v3 }
 0x4c0   :  { %v675_v4 = vpop.eup %674 }
 0x4c1   :  { %v409_v5 = vmul.f32 0.6931472, %v675_v4 }
 0x4c3   :  { %v410_v7 = vsub.f32 %v407_v6, %v409_v5 }
 0x538   :  { %v654_v61 = vpop.f32.mrf.mxu1 }
 0x539   :  { %v521_v0 = vsub.f32 0.0, %v654_v61 }
 0x53a   :  { %v512_v62 = vpop.f32.mrf.mxu1 }
 0x53b   :  { %v522_v63 = vadd.f32 14.703016, %v512_v62 }
 0x53d   :  { %v523_v1 = vmul.f32 -0.5, %v522_v63 }
 0x53f   :  { %v524_v2 = vadd.f32 %v523_v1, %v521_v0 }
 0x541   :  { %526 = vrot.lane.b32.xlu0 %v524_v2, %s709_s1 }
 0x5b3   :  { %v527_v8 = vpop.permute.xlu0 %526 }
 0x5b4   :  { %v529_v9 = vadd.f32 %v527_v8, %v410_v7 }
 0x5b6   :  { %v531_v10 = vsel %vm530_vm7, %v529_v9, -inf }
 0x5b7   :  { %532 = vmax.xlane.f32.xlu0 %v531_v10 }
 0x640   :  { %v533_v11 = vpop.xlane.xlu0 %532 }
 0x641   :  { %v534_v12 = vsub.f32 %v529_v9, %v533_v11 }
 0x643   :  { %v535_v13 = vmul.f32 1.442695, %v534_v12 }
 0x645   :  { %676 = vpow2.f32 %v535_v13 }
 0x646   :  { %678 = vrcp.f32 %v404_v3 }
 0x652   :  { %v677_v14 = vpop.eup %676 }
 0x653   :  { %538 = vrot.lane.b32.xlu1 %v677_v14, %s709_s1  ;;  %v679_v18 = vpop.eup %678 }
 0x654   :  { %v549_v20 = vmul.f32 %v679_v18, %v402_v58 }
 0x656   :  { %v550_v24 = vsel %vm780_vm6, %v549_v20, %v548_v22 }
 0x6c5   :  { %v539_v15 = vpop.permute.xlu1 %538 }
 0x6c6   :  { %v542_v16 = vsel %vm541_vm8, %v539_v15, 0.0 }
 0x6c7   :  { %543 = vadd.xlane.f32.xlu1 %v542_v16 }
 0x750   :  { %v544_v17 = vpop.xlane.xlu1 %543 }
 0x751   :  { %680 = vlog2.f32 %v544_v17 }
 0x75e   :  { %v681_v19 = vpop.eup %680 }
 0x75f   :  { %v546_v21 = vmul.f32 0.6931472, %v681_v19 }
 0x761   :  { %v547_v23 = vadd.f32 %v546_v21, %v533_v11 }
 0x763   :  { %v552_v25 = vsel %vm551_vm12, %v547_v23, %v550_v24 }
 0x764   :  { %553 = vst [vmem:[%s816_s2] sm:$0xff] %v552_v25 }
 0x765   :  { %558 = vsyncpa [#allocation3], 1 }

</bundles_post_ra>
